<compile_context>
chip_gen: v5e
topology: v5e:2x2
jax: 0.10.0
libtpu: 0.0.40
codegen_flags: <defaults>
</compile_context>

<pallas_src>
import functools

import jax
import jax.numpy as jnp
from jax import lax
from jax.experimental import pallas as pl
from jax.experimental.pallas import tpu as pltpu

BN_EPS = 1e-5
LEAKY_SLOPE = 0.01  # PyTorch LeakyReLU default


def _conv_stats_kernel(x_ref, w_ref, y_ref, mean_ref, m2_ref, *,
                       k, stride, wq, wo, rw, inv_count):
    # x_ref : (s*s, Cin, Lq)   phase-split, spatially-flattened padded image
    # w_ref : (k*k, Cout, Cin) conv weights, one (Cout, Cin) slab per tap
    # y_ref : (Cout, Rw)       pre-BN conv output, wide row pitch Wq (lane-dense)
    # mean_ref, m2_ref : (Cout, 1) per-image BN stats (mean, sum((y-mean)^2))
    cout = y_ref.shape[0]
    acc = jnp.zeros((cout, rw), jnp.float32)
    for kh in range(k):
        for kw in range(k):
            ph, dh = kh % stride, kh // stride
            pw, dw = kw % stride, kw // stride
            d = dh * wq + dw                       # static flat shift
            xs = x_ref[ph * stride + pw, :, d:d + rw]          # (Cin, Rw)
            acc = acc + jnp.dot(w_ref[kh * k + kw], xs,
                                preferred_element_type=jnp.float32)
    # Wide position r maps to (ho, w') = divmod(r, Wq); only w' < Wo are real
    # outputs, the remaining columns are row-wraparound garbage -> mask them
    # out of the batch statistics.
    lane = lax.broadcasted_iota(jnp.int32, (cout, rw), 1)
    valid = (lane % wq) < wo
    ym = jnp.where(valid, acc, 0.0)
    mean_t = jnp.sum(ym, axis=1, keepdims=True) * inv_count
    diff = jnp.where(valid, acc - mean_t, 0.0)
    mean_ref[...] = mean_t
    m2_ref[...] = jnp.sum(diff * diff, axis=1, keepdims=True)
    y_ref[...] = acc.astype(y_ref.dtype)


def _pick_vmem_limit():
    # Generation-aware VMEM budget: <= 3/4 of physical (v7x: 64 MiB physical ->
    # 48 MiB; v5e/v6e: 128 MiB -> capped at 96 MiB).  Fallback is safe everywhere.
    try:
        cap = int(pltpu.get_tpu_info().vmem_capacity_bytes)
        return min(96 * 1024 * 1024, (cap * 3) // 4)
    except Exception:
        return 40 * 1024 * 1024


@functools.partial(jax.jit, static_argnames=("stride", "padding", "mxu_dtype"))
def conv_block_forward(x, weight, bias, gamma, beta, *, stride, padding,
                       mxu_dtype=jnp.bfloat16):
    """x: (N, Cin, H, W); weight: (Cout, Cin, k, k) -> (N, Cout, Ho, Wo)."""
    del bias  # cancels exactly under training-mode BN mean subtraction
    n, cin, h, w = x.shape
    cout, _, k, _ = weight.shape
    s, p = stride, padding

    hp, wp = h + 2 * p, w + 2 * p
    ho = (hp - k) // s + 1
    wo = (wp - k) // s + 1
    hq, wq = -(-hp // s), -(-wp // s)             # per-phase grid size (ceil)
    rw = ho * wq                                  # wide (row-pitch Wq) output len
    dmax = ((k - 1) // s) * wq + (k - 1) // s     # largest in-kernel flat shift
    lq = max(hq * wq, rw + dmax)                  # flat length incl. shift slack

    # ---- Host prep (~1x input bytes, fused by XLA): cast early to the MXU
    # dtype, zero-pad, split into stride^2 phases, flatten spatial.
    x_sp = jnp.pad(x.astype(mxu_dtype),
                   ((0, 0), (0, 0), (p, p + s * hq - hp), (p, p + s * wq - wp)))
    x_ph = x_sp.reshape(n, cin, hq, s, wq, s).transpose(0, 3, 5, 1, 2, 4)
    x_ph = x_ph.reshape(n, s * s, cin, hq * wq)
    x_ph = jnp.pad(x_ph, ((0, 0), (0, 0), (0, 0), (0, lq - hq * wq)))
    # One (Cout, Cin) weight slab per kernel tap, indexed by kh*k + kw.
    w_taps = weight.transpose(2, 3, 0, 1).reshape(k * k, cout, cin).astype(mxu_dtype)

    y_dtype = (jnp.float32 if jnp.dtype(mxu_dtype) == jnp.dtype(jnp.float32)
               else jnp.bfloat16)
    kernel = functools.partial(_conv_stats_kernel, k=k, stride=s, wq=wq, wo=wo,
                               rw=rw, inv_count=1.0 / float(ho * wo))

    # ---- Single Pallas pass: conv (k^2 shifted matmuls, f32 accumulation) +
    # per-image BN statistics.  Grid = one step per batch image, all parallel.
    y_wide, mean_i, m2_i = pl.pallas_call(
        kernel,
        out_shape=(
            jax.ShapeDtypeStruct((n, cout, rw), y_dtype),
            jax.ShapeDtypeStruct((n, cout, 1), jnp.float32),
            jax.ShapeDtypeStruct((n, cout, 1), jnp.float32),
        ),
        grid_spec=pltpu.PrefetchScalarGridSpec(
            num_scalar_prefetch=0,
            grid=(n,),
            in_specs=[
                pl.BlockSpec((None, s * s, cin, lq), lambda i: (i, 0, 0, 0)),
                pl.BlockSpec((k * k, cout, cin), lambda i: (0, 0, 0)),
            ],
            out_specs=(
                pl.BlockSpec((None, cout, rw), lambda i: (i, 0, 0)),
                pl.BlockSpec((None, cout, 1), lambda i: (i, 0, 0)),
                pl.BlockSpec((None, cout, 1), lambda i: (i, 0, 0)),
            ),
        ),
        compiler_params=pltpu.CompilerParams(
            dimension_semantics=("parallel",),
            vmem_limit_bytes=_pick_vmem_limit()),
    )(x_ph, w_taps)

    # ---- Chan-style merge of per-image (mean, M2) into batch statistics.
    cnt = float(ho * wo)
    mean_i = mean_i[:, :, 0]                               # (N, Cout)
    m2_i = m2_i[:, :, 0]
    mean = jnp.mean(mean_i, axis=0)                        # (Cout,)
    m2 = jnp.sum(m2_i, axis=0) + cnt * jnp.sum(jnp.square(mean_i - mean), axis=0)
    var = m2 / (n * cnt)                                   # biased var (BN training)
    scale = gamma * lax.rsqrt(var + BN_EPS)
    shift = beta - mean * scale

    # ---- Epilogue (left to XLA per review): folded BN affine + LeakyReLU +
    # column de-pad fuse into the single final output write; the reshape is free.
    y = y_wide.reshape(n, cout, ho, wq)[:, :, :, :wo].astype(jnp.float32)
    y = y * scale.reshape(1, cout, 1, 1) + shift.reshape(1, cout, 1, 1)
    return jnp.where(y > 0, y, LEAKY_SLOPE * y)


def _reference(x, weight, bias, gamma, beta, *, stride, padding):
    y = lax.conv_general_dilated(
        x, weight, window_strides=(stride, stride),
        padding=[(padding, padding), (padding, padding)],
        dimension_numbers=("NCHW", "OIHW", "NCHW"))
    y = y + bias.reshape(1, -1, 1, 1)
    m = jnp.mean(y, axis=(0, 2, 3), keepdims=True)
    v = jnp.mean((y - m) ** 2, axis=(0, 2, 3), keepdims=True)
    y = (y - m) * lax.rsqrt(v + BN_EPS)
    y = y * gamma.reshape(1, -1, 1, 1) + beta.reshape(1, -1, 1, 1)
    return jnp.where(y > 0, y, LEAKY_SLOPE * y)


if __name__ == "__main__":
    # Small shapes consistent with the module: batch=2, in_channels=4,
    # out_channels=8, spatial=16x16, kernel=3, stride=1, padding=1.
    N, CIN, COUT, H, W = 2, 4, 8, 16, 16
    K, STRIDE, PAD = 3, 1, 1

    key = jax.random.PRNGKey(0)
    kx, kwt, kb = jax.random.split(key, 3)
    x = jax.random.normal(kx, (N, CIN, H, W), dtype=jnp.float32)
    weight = jax.random.normal(kwt, (COUT, CIN, K, K), dtype=jnp.float32) * 0.1
    bias = jax.random.normal(kb, (COUT,), dtype=jnp.float32) * 0.1
    gamma = jnp.ones((COUT,), jnp.float32)   # BatchNorm2d default weight
    beta = jnp.zeros((COUT,), jnp.float32)   # BatchNorm2d default bias

    ref = _reference(x, weight, bias, gamma, beta, stride=STRIDE, padding=PAD)

    # f32 MXU path: tight agreement with the PyTorch-semantics reference.
    out_f32 = conv_block_forward(x, weight, bias, gamma, beta,
                                 stride=STRIDE, padding=PAD,
                                 mxu_dtype=jnp.float32)
    out_f32 = jax.block_until_ready(out_f32)
    assert out_f32.shape == (N, COUT, H, W)
    assert jnp.allclose(out_f32, ref, atol=5e-4, rtol=5e-4), "f32 path mismatch"

    # bf16 default path (all generations): bf16 operands + bf16 y storage with
    # f32 accumulation/statistics -- documented precision tradeoff.
    out_bf16 = conv_block_forward(x, weight, bias, gamma, beta,
                                  stride=STRIDE, padding=PAD)
    out_bf16 = jax.block_until_ready(out_bf16)
    assert out_bf16.shape == (N, COUT, H, W)
    assert jnp.allclose(out_bf16, ref, atol=1e-1, rtol=1e-1), "bf16 path mismatch"

    print("KERNEL_OK")
</pallas_src>

<mosaic_0001>
module attributes {stable_mosaic.version = 11 : i64} {
  func.func @_conv_stats_kernel(%arg0: i32, %arg1: memref<1x1x4x326xf32, #tpu.memory_space<vmem>>, %arg2: memref<9x8x4xf32, #tpu.memory_space<vmem>>, %arg3: memref<1x8x288xf32, #tpu.memory_space<vmem>>, %arg4: memref<1x8x1xf32, #tpu.memory_space<vmem>>, %arg5: memref<1x8x1xf32, #tpu.memory_space<vmem>>) attributes {dimension_semantics = [#tpu.dimension_semantics<parallel>], iteration_bounds = array<i64: 2>, scalar_prefetch = 0 : i64, scratch_operands = 0 : i64, tpu.core_type = #tpu.core_type<tc>, window_params = [{transform_indices = @transform_0, window_bounds = array<i64: 1, 1, 4, 326>}, {pipeline_mode = #tpu.pipeline_mode<synchronous>, transform_indices = @transform_1, window_bounds = array<i64: 9, 8, 4>}, {transform_indices = @transform_2, window_bounds = array<i64: 1, 8, 288>}, {transform_indices = @transform_3, window_bounds = array<i64: 1, 8, 1>}, {transform_indices = @transform_4, window_bounds = array<i64: 1, 8, 1>}]} {
    %cst = arith.constant 0.000000e+00 : f32
    %0 = vector.broadcast %cst : f32 to vector<8x288xf32>
    %c0 = arith.constant 0 : index
    %c0_0 = arith.constant 0 : index
    %c0_1 = arith.constant 0 : index
    %c0_2 = arith.constant 0 : index
    %1 = vector.load %arg1[%c0, %c0_0, %c0_1, %c0_2] : memref<1x1x4x326xf32, #tpu.memory_space<vmem>>, vector<1x1x4x288xf32>
    %2 = vector.shape_cast %1 : vector<1x1x4x288xf32> to vector<4x288xf32>
    %c0_3 = arith.constant 0 : index
    %c0_4 = arith.constant 0 : index
    %c0_5 = arith.constant 0 : index
    %3 = vector.load %arg2[%c0_3, %c0_4, %c0_5] : memref<9x8x4xf32, #tpu.memory_space<vmem>>, vector<1x8x4xf32>
    %4 = vector.shape_cast %3 : vector<1x8x4xf32> to vector<8x4xf32>
    %cst_6 = arith.constant dense<0.000000e+00> : vector<8x288xf32>
    %5 = tpu.matmul %4, %2, %cst_6 {dimension_numbers = #tpu.dot_dimension_numbers<[1], [0], [0], [1], [0, 0, 1, 1], [], []>} : vector<8x4xf32>, vector<4x288xf32>, vector<8x288xf32> -> vector<8x288xf32>
    %6 = arith.addf %0, %5 : vector<8x288xf32>
    %c0_7 = arith.constant 0 : index
    %c0_8 = arith.constant 0 : index
    %c0_9 = arith.constant 0 : index
    %c1 = arith.constant 1 : index
    %7 = vector.load %arg1[%c0_7, %c0_8, %c0_9, %c1] : memref<1x1x4x326xf32, #tpu.memory_space<vmem>>, vector<1x1x4x288xf32>
    %8 = vector.shape_cast %7 : vector<1x1x4x288xf32> to vector<4x288xf32>
    %c1_10 = arith.constant 1 : index
    %c0_11 = arith.constant 0 : index
    %c0_12 = arith.constant 0 : index
    %9 = vector.load %arg2[%c1_10, %c0_11, %c0_12] : memref<9x8x4xf32, #tpu.memory_space<vmem>>, vector<1x8x4xf32>
    %10 = vector.shape_cast %9 : vector<1x8x4xf32> to vector<8x4xf32>
    %cst_13 = arith.constant dense<0.000000e+00> : vector<8x288xf32>
    %11 = tpu.matmul %10, %8, %cst_13 {dimension_numbers = #tpu.dot_dimension_numbers<[1], [0], [0], [1], [0, 0, 1, 1], [], []>} : vector<8x4xf32>, vector<4x288xf32>, vector<8x288xf32> -> vector<8x288xf32>
    %12 = arith.addf %6, %11 : vector<8x288xf32>
    %c0_14 = arith.constant 0 : index
    %c0_15 = arith.constant 0 : index
    %c0_16 = arith.constant 0 : index
    %c2 = arith.constant 2 : index
    %13 = vector.load %arg1[%c0_14, %c0_15, %c0_16, %c2] : memref<1x1x4x326xf32, #tpu.memory_space<vmem>>, vector<1x1x4x288xf32>
    %14 = vector.shape_cast %13 : vector<1x1x4x288xf32> to vector<4x288xf32>
    %c2_17 = arith.constant 2 : index
    %c0_18 = arith.constant 0 : index
    %c0_19 = arith.constant 0 : index
    %15 = vector.load %arg2[%c2_17, %c0_18, %c0_19] : memref<9x8x4xf32, #tpu.memory_space<vmem>>, vector<1x8x4xf32>
    %16 = vector.shape_cast %15 : vector<1x8x4xf32> to vector<8x4xf32>
    %cst_20 = arith.constant dense<0.000000e+00> : vector<8x288xf32>
    %17 = tpu.matmul %16, %14, %cst_20 {dimension_numbers = #tpu.dot_dimension_numbers<[1], [0], [0], [1], [0, 0, 1, 1], [], []>} : vector<8x4xf32>, vector<4x288xf32>, vector<8x288xf32> -> vector<8x288xf32>
    %18 = arith.addf %12, %17 : vector<8x288xf32>
    %c0_21 = arith.constant 0 : index
    %c0_22 = arith.constant 0 : index
    %c0_23 = arith.constant 0 : index
    %c18 = arith.constant 18 : index
    %19 = vector.load %arg1[%c0_21, %c0_22, %c0_23, %c18] : memref<1x1x4x326xf32, #tpu.memory_space<vmem>>, vector<1x1x4x288xf32>
    %20 = vector.shape_cast %19 : vector<1x1x4x288xf32> to vector<4x288xf32>
    %c3 = arith.constant 3 : index
    %c0_24 = arith.constant 0 : index
    %c0_25 = arith.constant 0 : index
    %21 = vector.load %arg2[%c3, %c0_24, %c0_25] : memref<9x8x4xf32, #tpu.memory_space<vmem>>, vector<1x8x4xf32>
    %22 = vector.shape_cast %21 : vector<1x8x4xf32> to vector<8x4xf32>
    %cst_26 = arith.constant dense<0.000000e+00> : vector<8x288xf32>
    %23 = tpu.matmul %22, %20, %cst_26 {dimension_numbers = #tpu.dot_dimension_numbers<[1], [0], [0], [1], [0, 0, 1, 1], [], []>} : vector<8x4xf32>, vector<4x288xf32>, vector<8x288xf32> -> vector<8x288xf32>
    %24 = arith.addf %18, %23 : vector<8x288xf32>
    %c0_27 = arith.constant 0 : index
    %c0_28 = arith.constant 0 : index
    %c0_29 = arith.constant 0 : index
    %c19 = arith.constant 19 : index
    %25 = vector.load %arg1[%c0_27, %c0_28, %c0_29, %c19] : memref<1x1x4x326xf32, #tpu.memory_space<vmem>>, vector<1x1x4x288xf32>
    %26 = vector.shape_cast %25 : vector<1x1x4x288xf32> to vector<4x288xf32>
    %c4 = arith.constant 4 : index
    %c0_30 = arith.constant 0 : index
    %c0_31 = arith.constant 0 : index
    %27 = vector.load %arg2[%c4, %c0_30, %c0_31] : memref<9x8x4xf32, #tpu.memory_space<vmem>>, vector<1x8x4xf32>
    %28 = vector.shape_cast %27 : vector<1x8x4xf32> to vector<8x4xf32>
    %cst_32 = arith.constant dense<0.000000e+00> : vector<8x288xf32>
    %29 = tpu.matmul %28, %26, %cst_32 {dimension_numbers = #tpu.dot_dimension_numbers<[1], [0], [0], [1], [0, 0, 1, 1], [], []>} : vector<8x4xf32>, vector<4x288xf32>, vector<8x288xf32> -> vector<8x288xf32>
    %30 = arith.addf %24, %29 : vector<8x288xf32>
    %c0_33 = arith.constant 0 : index
    %c0_34 = arith.constant 0 : index
    %c0_35 = arith.constant 0 : index
    %c20 = arith.constant 20 : index
    %31 = vector.load %arg1[%c0_33, %c0_34, %c0_35, %c20] : memref<1x1x4x326xf32, #tpu.memory_space<vmem>>, vector<1x1x4x288xf32>
    %32 = vector.shape_cast %31 : vector<1x1x4x288xf32> to vector<4x288xf32>
    %c5 = arith.constant 5 : index
    %c0_36 = arith.constant 0 : index
    %c0_37 = arith.constant 0 : index
    %33 = vector.load %arg2[%c5, %c0_36, %c0_37] : memref<9x8x4xf32, #tpu.memory_space<vmem>>, vector<1x8x4xf32>
    %34 = vector.shape_cast %33 : vector<1x8x4xf32> to vector<8x4xf32>
    %cst_38 = arith.constant dense<0.000000e+00> : vector<8x288xf32>
    %35 = tpu.matmul %34, %32, %cst_38 {dimension_numbers = #tpu.dot_dimension_numbers<[1], [0], [0], [1], [0, 0, 1, 1], [], []>} : vector<8x4xf32>, vector<4x288xf32>, vector<8x288xf32> -> vector<8x288xf32>
    %36 = arith.addf %30, %35 : vector<8x288xf32>
    %c0_39 = arith.constant 0 : index
    %c0_40 = arith.constant 0 : index
    %c0_41 = arith.constant 0 : index
    %c36 = arith.constant 36 : index
    %37 = vector.load %arg1[%c0_39, %c0_40, %c0_41, %c36] : memref<1x1x4x326xf32, #tpu.memory_space<vmem>>, vector<1x1x4x288xf32>
    %38 = vector.shape_cast %37 : vector<1x1x4x288xf32> to vector<4x288xf32>
    %c6 = arith.constant 6 : index
    %c0_42 = arith.constant 0 : index
    %c0_43 = arith.constant 0 : index
    %39 = vector.load %arg2[%c6, %c0_42, %c0_43] : memref<9x8x4xf32, #tpu.memory_space<vmem>>, vector<1x8x4xf32>
    %40 = vector.shape_cast %39 : vector<1x8x4xf32> to vector<8x4xf32>
    %cst_44 = arith.constant dense<0.000000e+00> : vector<8x288xf32>
    %41 = tpu.matmul %40, %38, %cst_44 {dimension_numbers = #tpu.dot_dimension_numbers<[1], [0], [0], [1], [0, 0, 1, 1], [], []>} : vector<8x4xf32>, vector<4x288xf32>, vector<8x288xf32> -> vector<8x288xf32>
    %42 = arith.addf %36, %41 : vector<8x288xf32>
    %c0_45 = arith.constant 0 : index
    %c0_46 = arith.constant 0 : index
    %c0_47 = arith.constant 0 : index
    %c37 = arith.constant 37 : index
    %43 = vector.load %arg1[%c0_45, %c0_46, %c0_47, %c37] : memref<1x1x4x326xf32, #tpu.memory_space<vmem>>, vector<1x1x4x288xf32>
    %44 = vector.shape_cast %43 : vector<1x1x4x288xf32> to vector<4x288xf32>
    %c7 = arith.constant 7 : index
    %c0_48 = arith.constant 0 : index
    %c0_49 = arith.constant 0 : index
    %45 = vector.load %arg2[%c7, %c0_48, %c0_49] : memref<9x8x4xf32, #tpu.memory_space<vmem>>, vector<1x8x4xf32>
    %46 = vector.shape_cast %45 : vector<1x8x4xf32> to vector<8x4xf32>
    %cst_50 = arith.constant dense<0.000000e+00> : vector<8x288xf32>
    %47 = tpu.matmul %46, %44, %cst_50 {dimension_numbers = #tpu.dot_dimension_numbers<[1], [0], [0], [1], [0, 0, 1, 1], [], []>} : vector<8x4xf32>, vector<4x288xf32>, vector<8x288xf32> -> vector<8x288xf32>
    %48 = arith.addf %42, %47 : vector<8x288xf32>
    %c0_51 = arith.constant 0 : index
    %c0_52 = arith.constant 0 : index
    %c0_53 = arith.constant 0 : index
    %c38 = arith.constant 38 : index
    %49 = vector.load %arg1[%c0_51, %c0_52, %c0_53, %c38] : memref<1x1x4x326xf32, #tpu.memory_space<vmem>>, vector<1x1x4x288xf32>
    %50 = vector.shape_cast %49 : vector<1x1x4x288xf32> to vector<4x288xf32>
    %c8 = arith.constant 8 : index
    %c0_54 = arith.constant 0 : index
    %c0_55 = arith.constant 0 : index
    %51 = vector.load %arg2[%c8, %c0_54, %c0_55] : memref<9x8x4xf32, #tpu.memory_space<vmem>>, vector<1x8x4xf32>
    %52 = vector.shape_cast %51 : vector<1x8x4xf32> to vector<8x4xf32>
    %cst_56 = arith.constant dense<0.000000e+00> : vector<8x288xf32>
    %53 = tpu.matmul %52, %50, %cst_56 {dimension_numbers = #tpu.dot_dimension_numbers<[1], [0], [0], [1], [0, 0, 1, 1], [], []>} : vector<8x4xf32>, vector<4x288xf32>, vector<8x288xf32> -> vector<8x288xf32>
    %54 = arith.addf %48, %53 : vector<8x288xf32>
    %55 = tpu.iota {dimensions = array<i32: 1>} : vector<8x288xi32>
    %c18_i32 = arith.constant 18 : i32
    %c0_i32 = arith.constant 0 : i32
    %56 = arith.cmpi eq, %c18_i32, %c0_i32 : i32
    %c1_i32 = arith.constant 1 : i32
    %57 = arith.select %56, %c1_i32, %c18_i32 : i32
    %58 = vector.broadcast %57 : i32 to vector<8x288xi32>
    %59 = arith.remsi %55, %58 : vector<8x288xi32>
    %c0_i32_57 = arith.constant 0 : i32
    %60 = vector.broadcast %c0_i32_57 : i32 to vector<8x288xi32>
    %61 = arith.cmpi ne, %59, %60 : vector<8x288xi32>
    %c0_i32_58 = arith.constant 0 : i32
    %62 = vector.broadcast %c0_i32_58 : i32 to vector<8x288xi32>
    %63 = arith.cmpi slt, %59, %62 : vector<8x288xi32>
    %c0_i32_59 = arith.constant 0 : i32
    %64 = arith.cmpi slt, %57, %c0_i32_59 : i32
    %65 = vector.broadcast %64 : i1 to vector<8x288xi1>
    %66 = vector.broadcast %65 : vector<8x288xi1> to vector<8x288xi1>
    %67 = arith.xori %63, %66 : vector<8x288xi1>
    %68 = arith.andi %67, %61 : vector<8x288xi1>
    %69 = vector.broadcast %57 : i32 to vector<8x288xi32>
    %70 = arith.addi %59, %69 : vector<8x288xi32>
    %71 = arith.select %68, %70, %59 : vector<8x288xi1>, vector<8x288xi32>
    %c16_i32 = arith.constant 16 : i32
    %72 = vector.broadcast %c16_i32 : i32 to vector<8x288xi32>
    %73 = arith.cmpi slt, %71, %72 : vector<8x288xi32>
    %cst_60 = arith.constant 0.000000e+00 : f32
    %74 = vector.broadcast %cst_60 : f32 to vector<8x288xf32>
    %75 = arith.select %73, %54, %74 : vector<8x288xi1>, vector<8x288xf32>
    %cst_61 = arith.constant dense<0.000000e+00> : vector<8xf32>
    %76 = vector.multi_reduction <add>, %75, %cst_61 [1] : vector<8x288xf32> to vector<8xf32>
    %77 = vector.shape_cast %76 : vector<8xf32> to vector<8x1xf32>
    %cst_62 = arith.constant 3.906250e-03 : f32
    %78 = vector.broadcast %cst_62 : f32 to vector<8x1xf32>
    %79 = arith.mulf %77, %78 : vector<8x1xf32>
    %80 = vector.broadcast %79 : vector<8x1xf32> to vector<8x288xf32>
    %81 = arith.subf %54, %80 : vector<8x288xf32>
    %cst_63 = arith.constant 0.000000e+00 : f32
    %82 = vector.broadcast %cst_63 : f32 to vector<8x288xf32>
    %83 = arith.select %73, %81, %82 : vector<8x288xi1>, vector<8x288xf32>
    %c0_64 = arith.constant 0 : index
    %c0_65 = arith.constant 0 : index
    %c0_66 = arith.constant 0 : index
    %84 = vector.load %arg4[%c0_64, %c0_65, %c0_66] : memref<1x8x1xf32, #tpu.memory_space<vmem>>, vector<1x8x1xf32>
    %85 = vector.shape_cast %84 : vector<1x8x1xf32> to vector<8x1xf32>
    %86 = vector.shape_cast %79 : vector<8x1xf32> to vector<1x8x1xf32>
    tpu.vector_store %arg4[%c0_64, %c0_65, %c0_66], %86 {strides = array<i32>} : memref<1x8x1xf32, #tpu.memory_space<vmem>>, vector<1x8x1xf32>,
    %87 = arith.mulf %83, %83 : vector<8x288xf32>
    %cst_67 = arith.constant dense<0.000000e+00> : vector<8xf32>
    %88 = vector.multi_reduction <add>, %87, %cst_67 [1] : vector<8x288xf32> to vector<8xf32>
    %89 = vector.shape_cast %88 : vector<8xf32> to vector<8x1xf32>
    %c0_68 = arith.constant 0 : index
    %c0_69 = arith.constant 0 : index
    %c0_70 = arith.constant 0 : index
    %90 = vector.load %arg5[%c0_68, %c0_69, %c0_70] : memref<1x8x1xf32, #tpu.memory_space<vmem>>, vector<1x8x1xf32>
    %91 = vector.shape_cast %90 : vector<1x8x1xf32> to vector<8x1xf32>
    %92 = vector.shape_cast %89 : vector<8x1xf32> to vector<1x8x1xf32>
    tpu.vector_store %arg5[%c0_68, %c0_69, %c0_70], %92 {strides = array<i32>} : memref<1x8x1xf32, #tpu.memory_space<vmem>>, vector<1x8x1xf32>,
    %c0_71 = arith.constant 0 : index
    %c0_72 = arith.constant 0 : index
    %c0_73 = arith.constant 0 : index
    %93 = vector.load %arg3[%c0_71, %c0_72, %c0_73] : memref<1x8x288xf32, #tpu.memory_space<vmem>>, vector<1x8x288xf32>
    %94 = vector.shape_cast %93 : vector<1x8x288xf32> to vector<8x288xf32>
    %95 = vector.shape_cast %54 : vector<8x288xf32> to vector<1x8x288xf32>
    tpu.vector_store %arg3[%c0_71, %c0_72, %c0_73], %95 {strides = array<i32>} : memref<1x8x288xf32, #tpu.memory_space<vmem>>, vector<1x8x288xf32>,
    return
  }
  func.func @transform_0(%arg0: i32) -> (i32, i32, i32, i32) {
    %c0_i32 = arith.constant 0 : i32
    %c0_i32_0 = arith.constant 0 : i32
    %c0_i32_1 = arith.constant 0 : i32
    %c0_i32_2 = arith.constant 0 : i32
    return %arg0, %c0_i32, %c0_i32_0, %c0_i32_1 : i32, i32, i32, i32
  }
  func.func @transform_1(%arg0: i32) -> (i32, i32, i32) {
    %c0_i32 = arith.constant 0 : i32
    %c0_i32_0 = arith.constant 0 : i32
    %c0_i32_1 = arith.constant 0 : i32
    %c0_i32_2 = arith.constant 0 : i32
    return %c0_i32, %c0_i32_0, %c0_i32_1 : i32, i32, i32
  }
  func.func @transform_2(%arg0: i32) -> (i32, i32, i32) {
    %c0_i32 = arith.constant 0 : i32
    %c0_i32_0 = arith.constant 0 : i32
    %c0_i32_1 = arith.constant 0 : i32
    return %arg0, %c0_i32, %c0_i32_0 : i32, i32, i32
  }
  func.func @transform_3(%arg0: i32) -> (i32, i32, i32) {
    %c0_i32 = arith.constant 0 : i32
    %c0_i32_0 = arith.constant 0 : i32
    %c0_i32_1 = arith.constant 0 : i32
    return %arg0, %c0_i32, %c0_i32_0 : i32, i32, i32
  }
  func.func @transform_4(%arg0: i32) -> (i32, i32, i32) {
    %c0_i32 = arith.constant 0 : i32
    %c0_i32_0 = arith.constant 0 : i32
    %c0_i32_1 = arith.constant 0 : i32
    return %arg0, %c0_i32, %c0_i32_0 : i32, i32, i32
  }
}

</mosaic_0001>

<bundles_post_ra>
// kernel: conv_block_forward.1
= control target key start
LH: loop header
LB: loop body
LE: loop exit
PB: predicated region body
PF: predicated region fallthrough
CT: control target
= control target key end

     0   :  { %s1428_s15 = smov 0   ;;  %s1642_s0 = inlined_call_operand.vmem [shape: f32[2,1,4,326], index: 0, kind: input, shape index: {}]   ;;  %s1643_s1 = inlined_call_operand.vmem [shape: f32[9,8,4], index: 1, kind: input, shape index: {}]   ;;  %s1644_s2 = inlined_call_operand.vmem [shape: f32[2,8,288], index: 2, kind: output, shape index: {0}]   ;;  %s1645_s3 = inlined_call_operand.vmem [shape: f32[2,8,1], index: 3, kind: output, shape index: {1}]   ;;  %s1646_s4 = inlined_call_operand.vmem [shape: f32[2,8,1], index: 4, kind: output, shape index: {2}]  }
   0x1 LB: > { %s1294_s16 = sadd.s32 4294967295, %s1392_s15   ;;  %p1298_p0 = scmp.ge.s32.totalorder %s1392_s15, 1  ;;  %s1392_s15 = sphi %s1428_s15, %s15_s15  }
   0x2   : > { %p167_p1 = scmp.lt.s32.totalorder %s1392_s15, 3 }
   0x4   : > { %p168_p2 = pnand %p1298_p0, %p167_p1 }
   0x5   : > { %p201_p3 = scmp.lt.s32.totalorder (!%p168_p2), %s1294_s16, 1  ;;  %s1394_s21 = smov (!%p168_p2), 127  }
   0x6   : > { %171 = sbr.rel (%p168_p2) target bundleno = 590 (0x24e), region = 28  ;;  %s1395_s22 = smov (!%p168_p2), 126  }
   0x7   : > { %s1396_s23 = smov (!%p168_p2), 110   ;;  %s1397_s24 = smov (!%p168_p2), 109  }
   0x8   : > { %s1398_s25 = smov (!%p168_p2), 108   ;;  %s1399_s26 = smov (!%p168_p2), 92  }
   0x9   : > { %s1400_s27 = smov (!%p168_p2), 91   ;;  %s1401_s28 = smov (!%p168_p2), 90  }
   0xb   : > { %s1658_s16 = smov (!%p201_p3, %s1294_s16), 1  ;;  %vm245_vm0 = vcmask 1043456   ;;  %vm241_vm1 = vcmask 31744   ;;  %v221_v36 = vld [vmem:[%s1643_s1] sm:$0xff]  ;;  %vm238_vm2 = vcmask 1039360   ;;  %v1303_v38 = vld [vmem:[%s1643_s1 + $0x8] sm:$0xff] }
   0xc   : > { %s1367_s17 = smul.u32 12, %s1658_s16  ;;  %vm405_vm3 = vcmask 1031168   ;;  %v1316_v43 = vld [vmem:[%s1643_s1 + $0x10] sm:$0xff]  ;;  %vm498_vm4 = vcmask 900096   ;;  %v1323_v53 = vld [vmem:[%s1643_s1 + $0x18] sm:$0xff]  ;;  %vm591_vm5 = vcmask 891904  }
   0xd   : > { %v1330_v59 = vld [vmem:[%s1643_s1 + $0x20] sm:$0xff]  ;;  %vm684_vm6 = vcmask 883712   ;;  %vm777_vm7 = vcmask 752640   ;;  %vm870_vm8 = vcmask 744448   ;;  %vm963_vm9 = vcmask 736256  }
   0xe   : > { %s1442_s20 = scalar_lea.vmem %s1642_s0, %s1367_s17 }
   0xf   : > { %v220_v0 = vld [vmem:[%s1442_s20 + $0x8] sm:$0xf]  ;;  %v1446_v1 = vld [vmem:[%s1442_s20] sm:$0xff] }
  0x10   : > { %228 = vst [vmem:[#allocation1 + $0x10] ss:$2 sm:$0xff] %v220_v0  ;;  %v388_v5 = vld [vmem:[%s1442_s20 + $0x8] sm:$0xf] }
  0x11   : > { %226 = vst [vmem:[#allocation1] ss:$2 sm:$0xff] %v1446_v1  ;;  %v481_v9 = vld [vmem:[%s1442_s20 + $0x8] sm:$0xf] }
  0x12   : > { %v574_v13 = vld [vmem:[%s1442_s20 + $0x8] sm:$0xf] }
  0x13   : > { %v667_v17 = vld [vmem:[%s1442_s20 + $0x8] sm:$0xf] }
  0x14   : > { %v760_v21 = vld [vmem:[%s1442_s20 + $0x8] sm:$0xf] }
  0x15   : > { %v853_v25 = vld [vmem:[%s1442_s20 + $0x8] sm:$0xf] }
  0x16   : > { %v946_v29 = vld [vmem:[%s1442_s20 + $0x8] sm:$0xf] }
  0x17   : > { %v231_v2 = vld.sshfl [vmem:[#allocation1 + $0x10] sm:$0xff pattern:$0x75316420] }
  0x18   : > { %236 = vrot.lane.b32.xlu0 %v231_v2, %s1394_s21  ;;  %314 = vst [vmem:[#allocation1 + $0x10] ss:$2 sm:$0xff] %v220_v0  ;;  %v230_v3 = vld.sshfl [vmem:[#allocation1 + $0x8] sm:$0xff pattern:$0x75316420] }
  0x19   : > { %234 = vrot.lane.b32.xlu1 %v230_v3, %s1394_s21  ;;  %v229_v4 = vld.sshfl [vmem:[#allocation1] sm:$0xff pattern:$0x75316420]  ;;  %v1337_v0 = vld [vmem:[%s1643_s1 + $0x28] sm:$0xff] }
  0x1a   : > { %312 = vst [vmem:[#allocation1] ss:$2 sm:$0xff] %v1446_v1 }
  0x1f   : > { %v1451_v6 = vld.sshfl [vmem:[#allocation1 + $0x10] sm:$0xff pattern:$0x75316420] }
  0x20   : > { %232 = vrot.lane.b32.xlu0 %v229_v4, %s1394_s21  ;;  %395 = vst [vmem:[#allocation1 + $0x10] ss:$2 sm:$0xff] %v388_v5 }
  0x21   : > { %v1453_v7 = vld.sshfl [vmem:[#allocation1] sm:$0xff pattern:$0x75316420]  ;;  %v1455_v8 = vld.sshfl [vmem:[#allocation1 + $0x8] sm:$0xff pattern:$0x75316420] }
  0x22   : > { %393 = vst [vmem:[#allocation1] ss:$2 sm:$0xff] %v1446_v1  ;;  %1310 = vmatpush.msk.msra.mxu3 %vm245_vm0, %v1453_v7 }
  0x23   : > { %1311 = vmatmul.msk.f32.vlgmr.msra.gmra.mxu3 %vm241_vm1, %v221_v36 }
  0x27   : > { %v398_v10 = vld.sshfl [vmem:[#allocation1 + $0x10] sm:$0xff pattern:$0x75316420] }
  0x28   : > { %488 = vst [vmem:[#allocation1 + $0x10] ss:$2 sm:$0xff] %v481_v9 }
  0x29   : > { %v396_v11 = vld.sshfl [vmem:[#allocation1] sm:$0xff pattern:$0x75316420]  ;;  %v397_v12 = vld.sshfl [vmem:[#allocation1 + $0x8] sm:$0xff pattern:$0x75316420] }
  0x2a   : > { %399 = vrot.lane.b32.xlu1 %v396_v11, %s1395_s22  ;;  %486 = vst [vmem:[#allocation1] ss:$2 sm:$0xff] %v1446_v1  ;;  %401 = vrot.lane.b32.xlu2 %v397_v12, %s1395_s22  ;;  %v1351_v12 = vld [vmem:[%s1643_s1 + $0x38] sm:$0xff] }
  0x2f   : > { %v491_v14 = vld.sshfl [vmem:[#allocation1 + $0x10] sm:$0xff pattern:$0x75316420] }
  0x30   : > { %581 = vst [vmem:[#allocation1 + $0x10] ss:$2 sm:$0xff] %v574_v13 }
  0x31   : > { %v490_v15 = vld.sshfl [vmem:[#allocation1 + $0x8] sm:$0xff pattern:$0x75316420]  ;;  %v489_v16 = vld.sshfl [vmem:[#allocation1] sm:$0xff pattern:$0x75316420] }
  0x32   : > { %496 = vrot.lane.b32.xlu1 %v491_v14, %s1396_s23  ;;  %494 = vrot.lane.b32.xlu0 %v490_v15, %s1396_s23  ;;  %579 = vst [vmem:[#allocation1] ss:$2 sm:$0xff] %v1446_v1 }
  0x33   : > { %403 = vrot.lane.b32.xlu2 %v398_v10, %s1395_s22 }
  0x37   : > { %v584_v18 = vld.sshfl [vmem:[#allocation1 + $0x10] sm:$0xff pattern:$0x75316420] }
  0x38   : > { %674 = vst [vmem:[#allocation1 + $0x10] ss:$2 sm:$0xff] %v667_v17 }
  0x39   : > { %v583_v19 = vld.sshfl [vmem:[#allocation1 + $0x8] sm:$0xff pattern:$0x75316420]  ;;  %v582_v20 = vld.sshfl [vmem:[#allocation1] sm:$0xff pattern:$0x75316420] }
  0x3a   : > { %589 = vrot.lane.b32.xlu0 %v584_v18, %s1397_s24  ;;  %585 = vrot.lane.b32.xlu1 %v582_v20, %s1397_s24  ;;  %672 = vst [vmem:[#allocation1] ss:$2 sm:$0xff] %v1446_v1  ;;  %v1358_v18 = vld [vmem:[%s1643_s1 + $0x40] sm:$0xff] }
  0x3b   : > { %492 = vrot.lane.b32.xlu2 %v489_v16, %s1396_s23  ;;  %s1368_s23 = smul.u32 24, %s1658_s16 }
  0x3f   : > { %v677_v22 = vld.sshfl [vmem:[#allocation1 + $0x10] sm:$0xff pattern:$0x75316420] }
  0x40   : > { %767 = vst [vmem:[#allocation1 + $0x10] ss:$2 sm:$0xff] %v760_v21  ;;  %v1038_v21 = vlaneseq }
  0x41   : > { %v676_v23 = vld.sshfl [vmem:[#allocation1 + $0x8] sm:$0xff pattern:$0x75316420]  ;;  %v675_v24 = vld.sshfl [vmem:[#allocation1] sm:$0xff pattern:$0x75316420] }
  0x42   : > { %680 = vrot.lane.b32.xlu1 %v676_v23, %s1398_s25  ;;  %678 = vrot.lane.b32.xlu0 %v675_v24, %s1398_s25  ;;  %765 = vst [vmem:[#allocation1] ss:$2 sm:$0xff] %v1446_v1 }
  0x43   : > { %587 = vrot.lane.b32.xlu2 %v583_v19, %s1397_s24 }
  0x47   : > { %v770_v26 = vld.sshfl [vmem:[#allocation1 + $0x10] sm:$0xff pattern:$0x75316420] }
  0x48   : > { %860 = vst [vmem:[#allocation1 + $0x10] ss:$2 sm:$0xff] %v853_v25 }
  0x49   : > { %v769_v27 = vld.sshfl [vmem:[#allocation1 + $0x8] sm:$0xff pattern:$0x75316420]  ;;  %v768_v28 = vld.sshfl [vmem:[#allocation1] sm:$0xff pattern:$0x75316420] }
  0x4a   : > { %682 = vrot.lane.b32.xlu1 %v677_v22, %s1398_s25  ;;  %773 = vrot.lane.b32.xlu0 %v769_v27, %s1399_s26  ;;  %858 = vst [vmem:[#allocation1] ss:$2 sm:$0xff] %v1446_v1  ;;  %v1558_v22 = vand.u32 127, %v1038_v21 }
  0x4b   : > { %771 = vrot.lane.b32.xlu2 %v768_v28, %s1399_s26 }
  0x4c   : > { %v1563_v24 = vadd.s32 128, %v1558_v22  ;;  %v1570_v28 = vadd.s32 256, %v1558_v22 }
  0x4e   : > { %v1074_v27 = vand.u32 65535, %v1563_v24 }
  0x4f   : > { %v863_v30 = vld.sshfl [vmem:[#allocation1 + $0x10] sm:$0xff pattern:$0x75316420] }
  0x50   : > { %953 = vst [vmem:[#allocation1 + $0x10] ss:$2 sm:$0xff] %v946_v29  ;;  %v1046_v29 = vshrl.u32 %v1558_v22, 16 }
  0x51   : > { %v862_v31 = vld.sshfl [vmem:[#allocation1 + $0x8] sm:$0xff pattern:$0x75316420]  ;;  %v861_v32 = vld.sshfl [vmem:[#allocation1] sm:$0xff pattern:$0x75316420] }
  0x52   : > { %868 = vrot.lane.b32.xlu1 %v863_v30, %s1400_s27  ;;  %866 = vrot.lane.b32.xlu0 %v862_v31, %s1400_s27  ;;  %951 = vst [vmem:[#allocation1] ss:$2 sm:$0xff] %v1446_v1 }
  0x53   : > { %775 = vrot.lane.b32.xlu2 %v770_v26, %s1399_s26  ;;  %v1045_v26 = vand.u32 65535, %v1558_v22  ;;  %s210_s26 = scalar_lea.vmem %s1644_s2, %s1368_s23 }
  0x55   : > { %v1049_v30 = vmul.u32 58254, %v1045_v26 }
  0x57   : > { %v956_v33 = vld.sshfl [vmem:[#allocation1 + $0x10] sm:$0xff pattern:$0x75316420] }
  0x59   : > { %v954_v34 = vld.sshfl [vmem:[#allocation1] sm:$0xff pattern:$0x75316420]  ;;  %v955_v35 = vld.sshfl [vmem:[#allocation1 + $0x8] sm:$0xff pattern:$0x75316420] }
  0x5a   : > { %961 = vrot.lane.b32.xlu0 %v956_v33, %s1401_s28  ;;  %957 = vrot.lane.b32.xlu1 %v954_v34, %s1401_s28  ;;  %v1078_v33 = vmul.u32 58254, %v1074_v27 }
  0x5b   : > { %864 = vrot.lane.b32.xlu2 %v861_v32, %s1400_s27  ;;  %v1075_v32 = vshrl.u32 %v1563_v24, 16  ;;  %s1301_s27 = sshll.u32 %s1658_s16, 3 }
  0x5c   : > { %s214_s30 = scalar_lea.vmem %s1645_s3, %s1301_s27  ;;  %s218_s6 = scalar_lea.vmem %s1646_s4, %s1301_s27 }
  0x63   : > { %959 = vrot.lane.b32.xlu2 %v955_v35, %s1401_s28 }
  0x84   : > { %v402_v37 = vpop.permute.xlu2 %401 }
  0x8a   : > { %v237_v39 = vpop.permute.xlu0 %236 }
  0x8b   : > { %v235_v40 = vpop.permute.xlu1 %234  ;;  %1308 = vmatpush.msk.msra.mxu2 %vm245_vm0, %v237_v39 }
  0x8c   : > { %v240_v41 = vsel %vm238_vm2, %v235_v40, %v237_v39  ;;  %1309 = vmatmul.msk.f32.vlgmr.msra.gmra.mxu2 %vm241_vm1, %v1303_v38  ;;  %v1103_v39 = vand.u32 65535, %v1570_v28 }
  0x8d   : > { %1306 = vmatpush.msk.msra.mxu1 %vm245_vm0, %v240_v41  ;;  %v404_v42 = vpop.permute.xlu2 %403 }
  0x8e   : > { %1307 = vmatmul.msk.f32.vlgmr.msra.gmra.mxu1 %vm241_vm1, %v1303_v38  ;;  %v407_v44 = vsel %vm405_vm3, %v402_v37, %v404_v42 }
  0x8f   : > { %1319 = vmatpush.msk.msrb.mxu3 %vm245_vm0, %v407_v44  ;;  %1314 = vmatpush.msk.msrb.mxu1 %vm245_vm0, %v1451_v6  ;;  %v1081_v44 = vshll.u32 %v1078_v33, 16 }
  0x90   : > { %1320 = vmatmul.msk.f32.vlgmr.msrb.gmra.mxu3 %vm241_vm1, %v1316_v43 }
  0x92   : > { %v233_v45 = vpop.permute.xlu0 %232 }
  0x93   : > { %v239_v46 = vsel %vm238_vm2, %v233_v45, %v235_v40  ;;  %v1104_v40 = vshrl.u32 %v1570_v28, 16  ;;  %v1107_v45 = vmul.u32 58254, %v1103_v39 }
  0x94   : > { %1304 = vmatpush.msk.msra.mxu0 %vm245_vm0, %v239_v46 }
  0x95   : > { %1305 = vmatmul.msk.f32.vlgmr.msra.gmra.mxu0 %vm241_vm1, %v1303_v38  ;;  %v493_v47 = vpop.permute.xlu2 %492  ;;  %v1052_v38 = vshll.u32 %v1049_v30, 16 }
  0x96   : > { %1312 = vmatpush.msk.msrb.mxu0 %vm245_vm0, %v1455_v8  ;;  %1315 = vmatmul.msk.f32.vlgmr.msrb.gmra.mxu1 %vm241_vm1, %v221_v36  ;;  %v1344_v8 = vld [vmem:[%s1643_s1 + $0x30] sm:$0xff] }
  0x98   : > { %1321 = vmatpush.msk.msra.mxu0 %vm245_vm0, %v404_v42  ;;  %v1077_v42 = vmul.u32 14564, %v1074_v27 }
  0x9a   : > { %vm1085_vm11 = vc.u32 %v1077_v42, %v1081_v44 }
  0x9c   : > { %v400_v48 = vpop.permute.xlu1 %399 }
  0x9d   : > { %v406_v49 = vsel %vm405_vm3, %v400_v48, %v402_v37  ;;  %1313 = vmatmul.msk.f32.vlgmr.msrb.gmra.mxu0 %vm241_vm1, %v221_v36  ;;  %v588_v50 = vpop.permute.xlu2 %587  ;;  %v1048_v36 = vmul.u32 14564, %v1045_v26  ;;  %v1050_v37 = vmul.u32 14564, %v1046_v29  ;;  %v1106_v48 = vmul.u32 14564, %v1103_v39 }
  0x9e   : > { %1317 = vmatpush.msk.msrb.mxu2 %vm245_vm0, %v406_v49  ;;  %v1108_v49 = vmul.u32 14564, %v1104_v40 }
  0x9f   : > { %1318 = vmatmul.msk.f32.vlgmr.msrb.gmra.mxu2 %vm241_vm1, %v1316_v43  ;;  %v1054_v46 = vshll.u32 %v1050_v37, 16  ;;  %vm1056_vm10 = vc.u32 %v1048_v36, %v1052_v38 }
  0xa0   : > { %v1113_v27 = vshrl.u32 %v1108_v49, 16 }
  0xa4   : > { %v497_v51 = vpop.permute.xlu1 %496  ;;  %v495_v52 = vpop.permute.xlu0 %494 }
  0xa5   : > { %v500_v54 = vsel %vm498_vm4, %v495_v52, %v497_v51  ;;  %v499_v55 = vsel %vm498_vm4, %v493_v47, %v495_v52  ;;  %1328 = vmatpush.msk.msra.mxu3 %vm245_vm0, %v497_v51  ;;  %1322 = vmatmul.msk.f32.vlgmr.msra.gmra.mxu0 %vm241_vm1, %v1316_v43  ;;  %v772_v56 = vpop.permute.xlu2 %771  ;;  %v1079_v43 = vmul.u32 14564, %v1075_v32  ;;  %v1058_v47 = vadd.s32 %v1052_v38, %v1048_v36 }
  0xa6   : > { %1324 = vmatpush.msk.msra.mxu1 %vm245_vm0, %v499_v55  ;;  %1326 = vmatpush.msk.msra.mxu2 %vm245_vm0, %v500_v54  ;;  %v344_v34 = vpop.f32.mrf.mxu3  ;;  %v1087_v51 = vadd.s32 %v1081_v44, %v1077_v42  ;;  %v1110_v52 = vshll.u32 %v1107_v45, 16  ;;  %v1051_v54 = vmul.u32 58254, %v1046_v29  ;;  %v1402_v55 = vmov 0  }
  0xa7   : > { %1327 = vmatmul.msk.f32.vlgmr.msra.gmra.mxu2 %vm241_vm1, %v1323_v53  ;;  %1325 = vmatmul.msk.f32.vlgmr.msra.gmra.mxu1 %vm241_vm1, %v1323_v53  ;;  %vm1060_vm12 = vc.u32 %v1058_v47, %v1054_v46 }
  0xa8   : > { %1329 = vmatmul.msk.f32.vlgmr.msra.gmra.mxu3 %vm241_vm1, %v1323_v53  ;;  %vm1114_vm13 = vc.u32 %v1106_v48, %v1110_v52 }
  0xac   : > { %v590_v57 = vpop.permute.xlu0 %589  ;;  %v586_v58 = vpop.permute.xlu1 %585 }
  0xad   : > { %v593_v60 = vsel %vm591_vm5, %v588_v50, %v590_v57  ;;  %v592_v61 = vsel %vm591_vm5, %v586_v58, %v588_v50  ;;  %1335 = vmatpush.msk.msrb.mxu2 %vm245_vm0, %v590_v57  ;;  %v776_v2 = vpop.permute.xlu2 %775  ;;  %v1083_v50 = vshll.u32 %v1079_v43, 16  ;;  %v1080_v57 = vmul.u32 58254, %v1075_v32 }
  0xae   : > { %1331 = vmatpush.msk.msrb.mxu0 %vm245_vm0, %v592_v61  ;;  %1333 = vmatpush.msk.msrb.mxu1 %vm245_vm0, %v593_v60  ;;  %v1086_v58 = vsel %vm1085_vm11, 1, %v1402_v55  ;;  %v1116_v60 = vadd.s32 %v1110_v52, %v1106_v48 }
  0xaf   : > { %1336 = vmatmul.msk.f32.vlgmr.msrb.gmra.mxu2 %vm241_vm1, %v1330_v59  ;;  %1332 = vmatmul.msk.f32.vlgmr.msrb.gmra.mxu0 %vm241_vm1, %v1330_v59  ;;  %vm1089_vm14 = vc.u32 %v1087_v51, %v1083_v50 }
  0xb0   : > { %1334 = vmatmul.msk.f32.vlgmr.msrb.gmra.mxu1 %vm241_vm1, %v1330_v59  ;;  %v1112_v59 = vshll.u32 %v1108_v49, 16 }
  0xb2   : > { %vm1118_vm15 = vc.u32 %v1116_v60, %v1112_v59 }
  0xb4   : > { %v681_v62 = vpop.permute.xlu1 %680  ;;  %v679_v63 = vpop.permute.xlu0 %678 }
  0xb5   : > { %v685_v1 = vsel %vm684_vm6, %v679_v63, %v681_v62  ;;  %v865_v9 = vpop.permute.xlu2 %864 }
  0xb6   : > { %1338 = vmatpush.msk.msrb.mxu3 %vm245_vm0, %v685_v1 }
  0xb7   : > { %1339 = vmatmul.msk.f32.vlgmr.msrb.gmra.mxu3 %vm241_vm1, %v1337_v0 }
  0xbc   : > { %v683_v3 = vpop.permute.xlu1 %682  ;;  %v774_v4 = vpop.permute.xlu0 %773 }
  0xbd   : > { %v686_v5 = vsel %vm684_vm6, %v681_v62, %v683_v3  ;;  %v778_v6 = vsel %vm777_vm7, %v772_v56, %v774_v4  ;;  %v779_v7 = vsel %vm777_vm7, %v774_v4, %v776_v2  ;;  %1342 = vmatpush.msk.msra.mxu1 %vm245_vm0, %v683_v3  ;;  %v960_v15 = vpop.permute.xlu2 %959  ;;  %v1057_v56 = vsel %vm1056_vm10, 1, %v1402_v55 }
  0xbe   : > { %1340 = vmatpush.msk.msra.mxu0 %vm245_vm0, %v686_v5  ;;  %1343 = vmatmul.msk.f32.vlgmr.msra.gmra.mxu1 %vm241_vm1, %v1337_v0  ;;  %v1059_v63 = vadd.s32 %v1057_v56, %v1051_v54  ;;  %v1088_v3 = vadd.s32 %v1086_v58, %v1080_v57  ;;  %v1115_v4 = vsel %vm1114_vm13, 1, %v1402_v55  ;;  %v1090_v5 = vsel %vm1089_vm14, 1, %v1402_v55 }
  0xbf   : > { %1345 = vmatpush.msk.msra.mxu2 %vm245_vm0, %v778_v6  ;;  %1347 = vmatpush.msk.msra.mxu3 %vm245_vm0, %v779_v7  ;;  %v1053_v6 = vshrl.u32 %v1049_v30, 16  ;;  %vm1163_vm13 = vcmask 7168  }
  0xc0   : > { %1341 = vmatmul.msk.f32.vlgmr.msra.gmra.mxu0 %vm241_vm1, %v1337_v0  ;;  %1346 = vmatmul.msk.f32.vlgmr.msra.gmra.mxu2 %vm241_vm1, %v1344_v8  ;;  %v1109_v0 = vmul.u32 58254, %v1104_v40 }
  0xc1   : > { %1348 = vmatmul.msk.f32.vlgmr.msra.gmra.mxu3 %vm241_vm1, %v1344_v8  ;;  %1349 = vmatpush.msk.msrb.mxu0 %vm245_vm0, %v776_v2  ;;  %v1061_v2 = vsel %vm1060_vm12, 1, %v1402_v55  ;;  %vm1151_vm12 = vcmask 261120  }
  0xc2   : > { %v1063_v7 = vadd.s32 %v1061_v2, %v1059_v63 }
  0xc4   : > { %v869_v10 = vpop.permute.xlu1 %868  ;;  %v867_v11 = vpop.permute.xlu0 %866 }
  0xc5   : > { %v872_v13 = vsel %vm870_vm8, %v867_v11, %v869_v10  ;;  %v871_v14 = vsel %vm870_vm8, %v865_v9, %v867_v11  ;;  %1356 = vmatpush.msk.msrb.mxu3 %vm245_vm0, %v869_v10  ;;  %v1082_v9 = vshrl.u32 %v1078_v33, 16  ;;  %v1092_v10 = vadd.s32 %v1090_v5, %v1088_v3 }
  0xc6   : > { %1352 = vmatpush.msk.msrb.mxu1 %vm245_vm0, %v871_v14  ;;  %1354 = vmatpush.msk.msrb.mxu2 %vm245_vm0, %v872_v13  ;;  %v1119_v11 = vsel %vm1118_vm15, 1, %v1402_v55  ;;  %v1055_v13 = vshrl.u32 %v1050_v37, 16  ;;  %v1064_v14 = vadd.s32 %v1063_v7, %v1053_v6 }
  0xc7   : > { %1353 = vmatmul.msk.f32.vlgmr.msrb.gmra.mxu1 %vm241_vm1, %v1351_v12 }
  0xc8   : > { %1350 = vmatmul.msk.f32.vlgmr.msrb.gmra.mxu0 %vm241_vm1, %v1344_v8  ;;  %1355 = vmatmul.msk.f32.vlgmr.msrb.gmra.mxu2 %vm241_vm1, %v1351_v12  ;;  %v1117_v8 = vadd.s32 %v1115_v4, %v1109_v0  ;;  %v1065_v26 = vadd.s32 %v1064_v14, %v1055_v13 }
  0xc9   : > { %1357 = vmatmul.msk.f32.vlgmr.msrb.gmra.mxu3 %vm241_vm1, %v1351_v12 }
  0xca   : > { %v1066_v33 = vshrl.u32 %v1065_v26, 4 }
  0xcc   : > { %v962_v16 = vpop.permute.xlu0 %961  ;;  %v958_v17 = vpop.permute.xlu1 %957  ;;  %v1067_v46 = vmul.u32 18, %v1066_v33 }
  0xcd   : > { %v965_v19 = vsel %vm963_vm9, %v960_v15, %v962_v16  ;;  %v964_v20 = vsel %vm963_vm9, %v958_v17, %v960_v15  ;;  %1363 = vmatpush.msk.msra.mxu2 %vm245_vm0, %v962_v16  ;;  %v1111_v15 = vshrl.u32 %v1107_v45, 16  ;;  %v1121_v16 = vadd.s32 %v1119_v11, %v1117_v8 }
  0xce   : > { %1359 = vmatpush.msk.msra.mxu0 %vm245_vm0, %v964_v20  ;;  %1361 = vmatpush.msk.msra.mxu1 %vm245_vm0, %v965_v19  ;;  %v1084_v19 = vshrl.u32 %v1079_v43, 16  ;;  %v1093_v20 = vadd.s32 %v1092_v10, %v1082_v9  ;;  %v1068_v51 = vsub.s32 %v1558_v22, %v1067_v46 }
  0xcf   : > { %1362 = vmatmul.msk.f32.vlgmr.msra.gmra.mxu1 %vm241_vm1, %v1358_v18  ;;  %v1122_v29 = vadd.s32 %v1121_v16, %v1111_v15 }
  0xd0   : > { %1360 = vmatmul.msk.f32.vlgmr.msra.gmra.mxu0 %vm241_vm1, %v1358_v18  ;;  %1364 = vmatmul.msk.f32.vlgmr.msra.gmra.mxu2 %vm241_vm1, %v1358_v18  ;;  %v1094_v32 = vadd.s32 %v1093_v20, %v1084_v19  ;;  %vm1129_vm0 = vcmp.ne.s32.totalorder %v1068_v51, 0  ;;  %vm1132_vm1 = vcmp.lt.s32.totalorder %v1068_v51, 0 }
  0xd1   : > { %v1123_v38 = vadd.s32 %v1122_v29, %v1113_v27  ;;  %vm1588_vm4 = vmand %vm1132_vm1, %vm1129_vm0 }
  0xd2   : > { %v1095_v42 = vshrl.u32 %v1094_v32, 4 }
  0xd3   : > { %v1124_v43 = vshrl.u32 %v1123_v38, 4 }
  0xd4   : > { %v1096_v48 = vmul.u32 18, %v1095_v42 }
  0xd5   : > { %v1125_v52 = vmul.u32 18, %v1124_v43 }
  0xd7   : > { %v1126_v58 = vsub.s32 %v1570_v28, %v1125_v52 }
  0xd9   : > { %vm1131_vm5 = vcmp.ne.s32.totalorder %v1126_v58, 0  ;;  %vm1134_vm6 = vcmp.lt.s32.totalorder %v1126_v58, 0  ;;  %v1140_v4 = vadd.s32 18, %v1126_v58 }
  0xda   : > { %vm1137_vm8 = vmand %vm1134_vm6, %vm1131_vm5 }
  0xdb   : > { %v1143_v13 = vsel %vm1137_vm8, %v1140_v4, %v1126_v58 }
  0xdc   : > { %vm1611_vm11 = vcmp.lt.s32.totalorder %v1143_v13, 16 }
 0x10b   : > { %v1560_v23 = vpop.f32.mrf.mxu1 }
 0x10f   : > { %v1573_v31 = vpop.f32.mrf.mxu2 }
 0x112   : > { %v1565_v25 = vpop.f32.mrf.mxu0 }
 0x113   : > { %v1576_v35 = vpop.f32.mrf.mxu1  ;;  %v454_v61 = vpop.f32.mrf.mxu3  ;;  %v345_v30 = vadd.f32 %v344_v34, %v1565_v25  ;;  %v1097_v34 = vsub.s32 %v1563_v24, %v1096_v48 }
 0x115   : > { %vm1130_vm2 = vcmp.ne.s32.totalorder %v1097_v34, 0  ;;  %vm1133_vm3 = vcmp.lt.s32.totalorder %v1097_v34, 0 }
 0x116   : > { %vm1592_vm7 = vmand %vm1133_vm3, %vm1130_vm2 }
 0x11a   : > { %v364_v41 = vpop.f32.mrf.mxu0 }
 0x11b   : > { %v365_v39 = vadd.f32 %v364_v41, %v1560_v23  ;;  %v385_v23 = vadd.f32 %v1576_v35, %v1573_v31  ;;  %v1138_v31 = vadd.s32 18, %v1068_v51  ;;  %v1139_v35 = vadd.s32 18, %v1097_v34 }
 0x11d   : > { %v478_v47 = vadd.f32 %v454_v61, %v365_v39  ;;  %v1141_v6 = vsel %vm1588_vm4, %v1138_v31, %v1068_v51  ;;  %v1142_v7 = vsel %vm1592_vm7, %v1139_v35, %v1097_v34 }
 0x11e   : > { %vm1603_vm9 = vcmp.lt.s32.totalorder %v1141_v6, 16  ;;  %vm1607_vm10 = vcmp.lt.s32.totalorder %v1142_v7, 16 }
 0x122   : > { %v434_v53 = vpop.f32.mrf.mxu2  ;;  %v474_v1 = vpop.f32.mrf.mxu0 }
 0x123   : > { %v477_v45 = vadd.f32 %v434_v53, %v345_v30  ;;  %v479_v22 = vadd.f32 %v474_v1, %v385_v23 }
 0x124   : > { %v527_v62 = vpop.f32.mrf.mxu1 }
 0x125   : > { %v570_v49 = vadd.f32 %v527_v62, %v477_v45 }
 0x12a   : > { %v547_v12 = vpop.f32.mrf.mxu2 }
 0x12b   : > { %v567_v17 = vpop.f32.mrf.mxu3  ;;  %v571_v50 = vadd.f32 %v547_v12, %v478_v47 }
 0x12c   : > { %v620_v21 = vpop.f32.mrf.mxu0  ;;  %v572_v61 = vadd.f32 %v567_v17, %v479_v22 }
 0x12d   : > { %v640_v18 = vpop.f32.mrf.mxu1  ;;  %v663_v41 = vadd.f32 %v620_v21, %v570_v49 }
 0x12e   : > { %v664_v55 = vadd.f32 %v640_v18, %v571_v50 }
 0x132   : > { %v660_v36 = vpop.f32.mrf.mxu2 }
 0x133   : > { %v665_v0 = vadd.f32 %v660_v36, %v572_v61 }
 0x13a   : > { %v713_v37 = vpop.f32.mrf.mxu3 }
 0x13b   : > { %v753_v40 = vpop.f32.mrf.mxu1  ;;  %v756_v57 = vadd.f32 %v713_v37, %v663_v41 }
 0x13c   : > { %v758_v8 = vadd.f32 %v753_v40, %v665_v0 }
 0x13d   : > { %v733_v44 = vpop.f32.mrf.mxu0 }
 0x13e   : > { %v757_v59 = vadd.f32 %v733_v44, %v664_v55 }
 0x143   : > { %v806_v25 = vpop.f32.mrf.mxu2 }
 0x144   : > { %v899_v54 = vpop.f32.mrf.mxu1  ;;  %v826_v53 = vpop.f32.mrf.mxu3  ;;  %v849_v60 = vadd.f32 %v806_v25, %v756_v57 }
 0x145   : > { %v846_v56 = vpop.f32.mrf.mxu0  ;;  %v850_v62 = vadd.f32 %v826_v53, %v757_v59 }
 0x146   : > { %v942_v1 = vadd.f32 %v899_v54, %v849_v60  ;;  %v851_v12 = vadd.f32 %v846_v56, %v758_v8 }
 0x14b   : > { %v919_v63 = vpop.f32.mrf.mxu2 }
 0x14c   : > { %v943_v2 = vadd.f32 %v919_v63, %v850_v62  ;;  %v1012_v3 = vpop.f32.mrf.mxu1  ;;  %v939_v11 = vpop.f32.mrf.mxu3 }
 0x14d   : > { %v992_v5 = vpop.f32.mrf.mxu0  ;;  %v944_v16 = vadd.f32 %v939_v11, %v851_v12 }
 0x14e   : > { %v1035_v9 = vadd.f32 %v992_v5, %v942_v1  ;;  %v1036_v10 = vadd.f32 %v1012_v3, %v943_v2 }
 0x150   : > { %1174 = vst [vmem:[%s210_s26] sm:$0xff] %v1035_v9  ;;  %v1147_v19 = vsel %vm1603_vm9, %v1035_v9, 0.0  ;;  %v1148_v20 = vsel %vm1607_vm10, %v1036_v10, 0.0 }
 0x151   : > { %1175 = vst [vmem:[%s210_s26 + $0x8] sm:$0xff] %v1036_v10  ;;  %v1150_v27 = vadd.f32 %v1148_v20, %v1147_v19 }
 0x153   : > { %v1032_v17 = vpop.f32.mrf.mxu2 }
 0x154   : > { %v1037_v21 = vadd.f32 %v1032_v17, %v944_v16 }
 0x156   : > { %v1149_v26 = vsel %vm1611_vm11, %v1037_v21, 0.0  ;;  %1176 = vst.msk [vmem:[%s210_s26 + $0x10] sm:$0xff] %vm1151_vm12, %v1037_v21 }
 0x157   : > { %v1152_v29 = vsel %vm1151_vm12, %v1149_v26, 0.0 }
 0x158   : > { %v1153_v32 = vadd.f32 %v1152_v29, %v1150_v27 }
 0x15a   : > { %1154 = vadd.xlane.f32.xlu0 %v1153_v32 }
 0x1cd   : > { %v1155_v30 = vpop.xlane.xlu0 %1154 }
 0x1ce   : > { %v1156_v36 = vmul.f32 0.00390625, %v1155_v30 }
 0x1d0   : > { %v1157_v33 = vsub.f32 %v1035_v9, %v1156_v36  ;;  %v1158_v38 = vsub.f32 %v1036_v10, %v1156_v36  ;;  %v1159_v39 = vsub.f32 %v1037_v21, %v1156_v36  ;;  %1164 = vst.msk [vmem:[%s214_s30] sm:$0xff] %vm1163_vm13, %v1156_v36 }
 0x1d2   : > { %v1160_v37 = vsel %vm1603_vm9, %v1157_v33, 0.0  ;;  %v1161_v40 = vsel %vm1607_vm10, %v1158_v38, 0.0  ;;  %v1162_v42 = vsel %vm1611_vm11, %v1159_v39, 0.0 }
 0x1d3   : > { %v1165_v44 = vmul.f32 %v1160_v37, %v1160_v37  ;;  %v1166_v45 = vmul.f32 %v1161_v40, %v1161_v40  ;;  %v1167_v46 = vmul.f32 %v1162_v42, %v1162_v42 }
 0x1d5   : > { %v1168_v43 = vadd.f32 %v1166_v45, %v1165_v44  ;;  %v1169_v47 = vsel %vm1151_vm12, %v1167_v46, 0.0 }
 0x1d7   : > { %v1170_v48 = vadd.f32 %v1169_v47, %v1168_v43 }
 0x1d9   : > { %1171 = vadd.xlane.f32.xlu1 %v1170_v48 }
 0x24c   : > { %v1172_v50 = vpop.xlane.xlu1 %1171 }
 0x24d   : > { %1173 = vst.msk [vmem:[%s218_s6] sm:$0xff] %vm1163_vm13, %v1172_v50 }
 0x24e PF: > { %s15_s15 = sadd.s32 1, %s1392_s15  }
 0x24f   : > { %p12_p4 = scmp.ge.s32.totalorder %s15_s15, 4  }
 0x251   :  { %14 = sbr.rel (!%p12_p4) target bundleno = 1 (0x1), region = 99 }

</bundles_post_ra>
